<compile_context>
chip_gen: v7x
topology: tpu7x:2x2x1
jax: 0.10.0
libtpu: 0.0.40
codegen_flags: <defaults>
</compile_context>

<pallas_src>
import functools

import jax
import jax.numpy as jnp
from jax import lax
from jax.experimental import pallas as pl
from jax.experimental.pallas import tpu as pltpu

LANES = 128
SUBLANES = 8
EPS = 1e-8

# Generation-aware tile / VMEM / TensorCore configuration.
_GEN_CONFIG = {
    # 8192x128 f32 = 4 MiB per input per pipeline buffer -> 16 MiB of buffers;
    # explicit scoped limit leaves headroom for the f32 temps on v7x's 64 MiB.
    "v7": dict(max_block_rows=8192, vmem_limit_bytes=48 << 20, num_cores=2),
    "v6": dict(max_block_rows=4096, vmem_limit_bytes=64 << 20, num_cores=1),
    "v5": dict(max_block_rows=2048, vmem_limit_bytes=32 << 20, num_cores=1),
    "unknown": dict(max_block_rows=2048, vmem_limit_bytes=None, num_cores=1),
}


def _tpu_generation():
    """Best-effort TPU generation detection at trace time."""
    try:
        kind = jax.devices()[0].device_kind.lower()
    except Exception:
        return "unknown"
    if "7" in kind:
        return "v7"
    if "v6" in kind or "6e" in kind:
        return "v6"
    if "v5" in kind or "5e" in kind or "5p" in kind:
        return "v5"
    return "unknown"


def _pow_gamma(d, gamma):
    """gamma is a trace-time Python float (L0Loss fixes it to 2.0)."""
    if gamma == 2.0:
        return d * d                      # pure VALU, no EUP exp/log
    if gamma == 1.0:
        return d
    return jnp.power(d, jnp.float32(gamma))


def _make_l0_kernel(block_rows, n_inner, n_blocks, valid_rows_last,
                    has_pseudo, gamma):
    """Build the kernel body, specialized on trace-time constants."""
    # Tail handling is needed only if the last real block is partial or the
    # 2-way outer split created pseudo blocks (both imply block_rows % 8 == 0).
    need_tail_handling = has_pseudo or (valid_rows_last != block_rows)

    def _accumulate(out_ref, val):
        # (block_rows, 128) -> per-(sublane, lane) partial sums into the
        # resident (8, 128) accumulator block.  The reshape keeps the (8, 128)
        # minor tiles intact, so the axis-0 sum lowers to plain vreg VALU adds.
        full = (block_rows // SUBLANES) * SUBLANES
        if full:
            out_ref[...] += val[:full].reshape(-1, SUBLANES, LANES).sum(axis=0)
        rem = block_rows - full
        if rem:  # tiny single-block inputs (< 8 rows / non-multiple of 8)
            out_ref[0:rem, :] += val[full:block_rows, :]

    def kernel(true_ref, pred_ref, out_ref):
        o = pl.program_id(0)   # outer ("parallel") axis -> one slab per core
        i = pl.program_id(1)   # inner ("arbitrary") reduction axis

        # Output block is resident across the inner axis: it IS the accumulator.
        @pl.when(i == 0)
        def _():
            out_ref[...] = jnp.zeros_like(out_ref)

        t = true_ref[...].astype(jnp.float32)
        p = pred_ref[...].astype(jnp.float32)
        d = jnp.abs(t - p) + jnp.float32(EPS)
        val = _pow_gamma(d, gamma)

        if not need_tail_handling:
            # Steady state: every block is full and real -> unmasked accumulate.
            _accumulate(out_ref, val)
        else:
            gb = o * n_inner + i           # global block id (unclamped)

            @pl.when(gb < n_blocks - 1)
            def _():
                _accumulate(out_ref, val)  # full real blocks: no mask cost

            @pl.when(gb == n_blocks - 1)
            def _():
                # Partial last real block: mask OOB rows by block-local row
                # index (small int32, no global-index overflow risk).
                row = lax.broadcasted_iota(jnp.int32, val.shape, 0)
                vm = jnp.where(row < valid_rows_last, val, jnp.float32(0.0))
                _accumulate(out_ref, vm)

            # Pseudo blocks (gb >= n_blocks) accumulate nothing at all.

    return kernel


@functools.partial(jax.jit, static_argnames=("gamma",))
def l0_loss(y_true, y_pred, gamma=2.0):
    """L0Loss forward: mean((|y_true - y_pred| + 1e-8) ** gamma)."""
    assert y_true.shape == y_pred.shape
    gamma = float(gamma)
    n_elem = int(y_true.size)

    # Free reshape of contiguous tensors to a lane-dense slab; no dtype cast
    # here, so bf16/f32 inputs stream at native width.
    flat_t = y_true.reshape(-1)
    flat_p = y_pred.reshape(-1)

    def elem_sum(t, p):
        dd = jnp.abs(t.astype(jnp.float32) - p.astype(jnp.float32))
        return jnp.sum(_pow_gamma(dd + jnp.float32(EPS), gamma))

    rows = n_elem // LANES
    n_aligned = rows * LANES

    # Ragged (<128-element) tail: tiny pure-JAX sum instead of a full-tensor
    # jnp.pad copy (which would roughly double HBM traffic on that path).
    tail_sum = jnp.float32(0.0)
    if n_aligned != n_elem:
        tail_sum = elem_sum(flat_t[n_aligned:], flat_p[n_aligned:])

    if rows == 0:
        # Fewer than 128 elements: nothing for the kernel to do.
        return tail_sum / jnp.float32(n_elem)

    t2d = flat_t[:n_aligned].reshape(rows, LANES)
    p2d = flat_p[:n_aligned].reshape(rows, LANES)

    cfg = _GEN_CONFIG[_tpu_generation()]

    # Sub-32-bit dtypes pack along sublanes: align block_rows to the packed
    # sublane granularity (8 f32 rows, 16 bf16, 32 int8/fp8) when possible.
    itemsize = jnp.dtype(y_true.dtype).itemsize
    granule = SUBLANES * max(1, 4 // max(1, itemsize))
    if rows >= granule:
        block_rows = min(cfg["max_block_rows"], (rows // granule) * granule)
    else:
        block_rows = rows                   # full-extent single block

    n_blocks = -(-rows // block_rows)       # ceil div
    # Shard the reduction across TensorCores only where there are 2 TCs (v7x);
    # on v5e/v6e a 2-way split only creates wasted pseudo blocks.
    n_outer = 2 if (cfg["num_cores"] >= 2 and n_blocks >= 2) else 1
    n_inner = -(-n_blocks // n_outer)
    has_pseudo = n_outer * n_inner > n_blocks
    valid_rows_last = rows - (n_blocks - 1) * block_rows

    def in_index_map(o, i):
        gb = o * n_inner + i
        if has_pseudo:
            # Pseudo blocks re-read the last real block; they skip accumulation
            # inside the kernel, so the data read is irrelevant.
            gb = jnp.minimum(gb, n_blocks - 1)
        return (gb, 0)

    kernel = _make_l0_kernel(block_rows, n_inner, n_blocks, valid_rows_last,
                             has_pseudo, gamma)

    partials = pl.pallas_call(
        kernel,
        out_shape=jax.ShapeDtypeStruct((n_outer * SUBLANES, LANES), jnp.float32),
        grid=(n_outer, n_inner),
        in_specs=[
            pl.BlockSpec((block_rows, LANES), in_index_map),
            pl.BlockSpec((block_rows, LANES), in_index_map),
        ],
        out_specs=pl.BlockSpec((SUBLANES, LANES), lambda o, i: (o, 0)),
        compiler_params=pltpu.CompilerParams(
            dimension_semantics=("parallel", "arbitrary"),
            vmem_limit_bytes=cfg["vmem_limit_bytes"],
        ),
    )(t2d, p2d)

    # Tiny JAX epilogue: cross-lane reduce of the (n_outer*8, 128) partials.
    total = jnp.sum(partials) + tail_sum
    return total / jnp.float32(n_elem)


if __name__ == "__main__":
    gamma = 2.0  # fixed by L0Loss.__init__ (self.gamma = torch.Tensor([2]))

    key = jax.random.PRNGKey(0)
    k1, k2 = jax.random.split(key)
    # NCHW inputs, small shapes
    y_true = jax.random.normal(k1, (2, 4, 16, 16), dtype=jnp.float32)
    y_pred = jax.random.normal(k2, (2, 4, 16, 16), dtype=jnp.float32)

    loss = l0_loss(y_true, y_pred, gamma=gamma)
    jax.block_until_ready(loss)

    # Reference check (plain JAX)
    ref = jnp.mean(jnp.power(jnp.abs(y_true - y_pred) + jnp.float32(EPS), gamma))
    assert jnp.allclose(loss, ref, rtol=1e-5, atol=1e-6), (loss, ref)

    print("KERNEL_OK")
</pallas_src>

<mosaic_0001>
module attributes {stable_mosaic.version = 11 : i64} {
  func.func @kernel(%arg0: i32, %arg1: i32, %arg2: memref<16x128xf32, #tpu.memory_space<vmem>>, %arg3: memref<16x128xf32, #tpu.memory_space<vmem>>, %arg4: memref<8x128xf32, #tpu.memory_space<vmem>>) attributes {dimension_semantics = [#tpu.dimension_semantics<parallel>, #tpu.dimension_semantics<arbitrary>], iteration_bounds = array<i64: 1, 1>, scalar_prefetch = 0 : i64, scratch_operands = 0 : i64, tpu.core_type = #tpu.core_type<tc>, window_params = [{transform_indices = @transform_0, window_bounds = array<i64: 16, 128>}, {transform_indices = @transform_1, window_bounds = array<i64: 16, 128>}, {transform_indices = @transform_2, window_bounds = array<i64: 8, 128>}]} {
    %c0_i32 = arith.constant 0 : i32
    %0 = arith.cmpi eq, %arg1, %c0_i32 : i32
    %1 = arith.extui %0 : i1 to i32
    %c0_i32_0 = arith.constant 0 : i32
    %2 = arith.cmpi ne, %1, %c0_i32_0 : i32
    scf.if %2 {
      %cst_9 = arith.constant 0.000000e+00 : f32
      %15 = vector.broadcast %cst_9 : f32 to vector<8x128xf32>
      %c0_10 = arith.constant 0 : index
      %c0_11 = arith.constant 0 : index
      %16 = vector.load %arg4[%c0_10, %c0_11] : memref<8x128xf32, #tpu.memory_space<vmem>>, vector<8x128xf32>
      tpu.vector_store %arg4[%c0_10, %c0_11], %15 {strides = array<i32>} : memref<8x128xf32, #tpu.memory_space<vmem>>, vector<8x128xf32>,
    } else {
    }
    %c0 = arith.constant 0 : index
    %c0_1 = arith.constant 0 : index
    %3 = vector.load %arg2[%c0, %c0_1] : memref<16x128xf32, #tpu.memory_space<vmem>>, vector<16x128xf32>
    %c0_2 = arith.constant 0 : index
    %c0_3 = arith.constant 0 : index
    %4 = vector.load %arg3[%c0_2, %c0_3] : memref<16x128xf32, #tpu.memory_space<vmem>>, vector<16x128xf32>
    %5 = arith.subf %3, %4 : vector<16x128xf32>
    %6 = math.absf %5 : vector<16x128xf32>
    %cst = arith.constant 9.99999993E-9 : f32
    %7 = vector.broadcast %cst : f32 to vector<16x128xf32>
    %8 = arith.addf %6, %7 : vector<16x128xf32>
    %9 = arith.mulf %8, %8 : vector<16x128xf32>
    %c0_4 = arith.constant 0 : index
    %c0_5 = arith.constant 0 : index
    %10 = vector.load %arg4[%c0_4, %c0_5] : memref<8x128xf32, #tpu.memory_space<vmem>>, vector<8x128xf32>
    %11 = vector.shape_cast %9 : vector<16x128xf32> to vector<2x8x128xf32>
    %cst_6 = arith.constant dense<0.000000e+00> : vector<8x128xf32>
    %12 = vector.multi_reduction <add>, %11, %cst_6 [0] : vector<2x8x128xf32> to vector<8x128xf32>
    %13 = arith.addf %10, %12 : vector<8x128xf32>
    %c0_7 = arith.constant 0 : index
    %c0_8 = arith.constant 0 : index
    %14 = vector.load %arg4[%c0_7, %c0_8] : memref<8x128xf32, #tpu.memory_space<vmem>>, vector<8x128xf32>
    tpu.vector_store %arg4[%c0_7, %c0_8], %13 {strides = array<i32>} : memref<8x128xf32, #tpu.memory_space<vmem>>, vector<8x128xf32>,
    return
  }
  func.func @transform_0(%arg0: i32, %arg1: i32) -> (i32, i32) {
    %c1_i32 = arith.constant 1 : i32
    %0 = arith.muli %arg0, %c1_i32 : i32
    %1 = arith.addi %0, %arg1 : i32
    %c0_i32 = arith.constant 0 : i32
    %c0_i32_0 = arith.constant 0 : i32
    return %1, %c0_i32 : i32, i32
  }
  func.func @transform_1(%arg0: i32, %arg1: i32) -> (i32, i32) {
    %c1_i32 = arith.constant 1 : i32
    %0 = arith.muli %arg0, %c1_i32 : i32
    %1 = arith.addi %0, %arg1 : i32
    %c0_i32 = arith.constant 0 : i32
    %c0_i32_0 = arith.constant 0 : i32
    return %1, %c0_i32 : i32, i32
  }
  func.func @transform_2(%arg0: i32, %arg1: i32) -> (i32, i32) {
    %c0_i32 = arith.constant 0 : i32
    %c0_i32_0 = arith.constant 0 : i32
    return %arg0, %c0_i32 : i32, i32
  }
}

</mosaic_0001>

<bundles_post_ra>
// kernel: l0_loss.1
= control target key start
LH: loop header
LB: loop body
LE: loop exit
PB: predicated region body
PF: predicated region fallthrough
CT: control target
= control target key end

     0   :  { %s123_s0 = inlined_call_operand.vmem [shape: f32[16,128], index: 0, kind: input, shape index: {}]   ;;  %s124_s1 = inlined_call_operand.vmem [shape: f32[16,128], index: 1, kind: input, shape index: {}]   ;;  %s125_s2 = inlined_call_operand.vmem [shape: f32[8,128], index: 2, kind: output, shape index: {}]  }
   0x1   :  { %v60_v0 = vld [vmem:[%s123_s0] sm:$0xff]  ;;  %v61_v1 = vld [vmem:[%s123_s0 + $0x8] sm:$0xff] }
   0x2   :  { %v62_v2 = vld [vmem:[%s124_s1] sm:$0xff]  ;;  %v63_v3 = vld [vmem:[%s124_s1 + $0x8] sm:$0xff] }
   0x3   :  { %v64_v4 = vsub.f32 %v60_v0, %v62_v2  ;;  %v65_v5 = vsub.f32 %v61_v1, %v63_v3 }
   0x5   :  { %v66_v6 = vand.u32 2147483647, %v64_v4  ;;  %v67_v7 = vand.u32 2147483647, %v65_v5 }
   0x7   :  { %v68_v8 = vadd.f32 1e-08, %v66_v6  ;;  %v69_v9 = vadd.f32 1e-08, %v67_v7 }
   0x9   :  { %v70_v10 = vmul.f32 %v68_v8, %v68_v8  ;;  %v71_v11 = vmul.f32 %v69_v9, %v69_v9 }
   0xb   :  { %v73_v12 = vadd.f32 %v71_v11, %v70_v10 }
   0xd   :  { %75 = vst [vmem:[%s125_s2] sm:$0xff] %v73_v12 }

</bundles_post_ra>
